<compile_context>
chip_gen: v7x
topology: tpu7x:2x2x1
jax: 0.10.0
libtpu: 0.0.40
codegen_flags: <defaults>
</compile_context>

<pallas_src>
import jax
import jax.numpy as jnp
from jax.experimental import pallas as pl
from jax.experimental.pallas import tpu as pltpu


def _subnet_kernel(b_ref, x_ref, w_ref, o_ref):
    # b_ref: (1,)     f32 in SMEM        (bias scalar, loaded once)
    # x_ref: (TB, D)  f32/bf16 in VMEM   (one batch tile)
    # w_ref: (1, D)   f32 in VMEM        (resident across the grid)
    # o_ref: (1, TB)  f32 in VMEM        (lane-dense output slab)
    xv = x_ref[...].astype(jnp.float32)                  # in-register upcast
    acc = jnp.sum(xv * w_ref[...], axis=-1)               # (TB,) VPU mul + lane reduce
    o_ref[...] = (acc + b_ref[0]).reshape(1, -1).astype(o_ref.dtype)


def _choose_row_tile(B, D, itemsize, target_bytes=12 * 1024 * 1024):
    """Batch tile so one x block is ~12 MiB; multiple of 128 rows (lane-dense out)."""
    rows = target_bytes // (itemsize * max(D, 1))
    rows = (rows // 128) * 128
    rows = max(int(rows), 128)
    if B > 128:
        # Guarantee >=2 grid steps so the "parallel" batch axis can shard
        # across v7x's two TensorCores instead of serializing on one TC.
        half = ((-(-B // 2)) + 127) // 128 * 128
        rows = min(rows, half)
    if rows >= B:
        return B  # single full-batch block (full-dim block is always legal)
    return rows


def subnet_forward(x, weight, bias, *, row_tile=None):
    """
    x:      (B, num_peak, num_tf)  float32 or bfloat16
    weight: (1, D) float32   (PyTorch nn.Linear layout, D = num_peak*num_tf)
    bias:   (1,)   float32
    returns (B, 1) float32
    """
    B = x.shape[0]
    D = int(x.shape[1] * x.shape[2])

    # Flatten exactly like torch's x.reshape(x.shape[0], -1). Metadata-only for
    # a contiguous array; NO dtype cast of the big activation here (any upcast
    # happens in-kernel on the loaded tile to avoid an extra HBM pass).
    x2d = x.reshape(B, D)
    if x2d.dtype not in (jnp.float32, jnp.bfloat16):
        x2d = x2d.astype(jnp.float32)
    w = weight.reshape(1, D).astype(jnp.float32)   # keep (1, D): D on lanes
    b = bias.reshape(1).astype(jnp.float32)        # SMEM scalar

    itemsize = x2d.dtype.itemsize
    tb = row_tile if row_tile is not None else _choose_row_tile(B, D, itemsize)
    if tb >= B:
        tb = B
    elif tb % 128 != 0:
        raise ValueError("row_tile must be a multiple of 128 or >= batch size")

    grid = (pl.cdiv(B, tb),)

    # VMEM: 2x double-buffered x tile + weight + output blocks + slack,
    # clamped under v7x's 64 MiB physical per-TC VMEM.
    vmem_bytes = 2 * tb * D * itemsize + 2 * D * 4 + 2 * tb * 4 + (2 << 20)
    vmem_bytes = int(min(max(vmem_bytes, 16 << 20), 48 << 20))

    cost = pl.CostEstimate(
        flops=2 * B * D,
        transcendentals=0,
        bytes_accessed=itemsize * B * D + 4 * (D + B),
    )

    out = pl.pallas_call(
        _subnet_kernel,
        out_shape=jax.ShapeDtypeStruct((1, B), jnp.float32),
        grid=grid,
        in_specs=[
            pl.BlockSpec(memory_space=pltpu.MemorySpace.SMEM),  # bias scalar
            pl.BlockSpec((tb, D), lambda i: (i, 0)),            # x row tiles
            pl.BlockSpec((1, D), lambda i: (0, 0)),             # resident weight
        ],
        out_specs=pl.BlockSpec((1, tb), lambda i: (0, i)),      # lane-dense slab
        compiler_params=pltpu.CompilerParams(
            dimension_semantics=("parallel",),
            vmem_limit_bytes=vmem_bytes,
        ),
        cost_estimate=cost,
    )(b, x2d, w)
    return out.reshape(B, 1)


def _make_case(B, num_peak, num_tf, key, dtype=jnp.float32):
    D = num_peak * num_tf
    kx, kw, kb = jax.random.split(key, 3)
    x = jax.random.normal(kx, (B, num_peak, num_tf), dtype=jnp.float32).astype(dtype)
    # Deterministic parameter init (mimics nn.Linear uniform(-1/sqrt(D), 1/sqrt(D)))
    bound = 1.0 / (D ** 0.5)
    weight = jax.random.uniform(kw, (1, D), minval=-bound, maxval=bound,
                                dtype=jnp.float32)
    bias = jax.random.uniform(kb, (1,), minval=-bound, maxval=bound,
                              dtype=jnp.float32)
    return x, weight, bias


if __name__ == "__main__":
    key = jax.random.PRNGKey(0)
    k1, k2, k3 = jax.random.split(key, 3)

    # Case 1: tiny shapes consistent with the module (B=2 samples, num_peak=4
    # cCREs, num_tf=8 TFs -> D=32); single full-batch block.
    B, num_peak, num_tf = 2, 4, 8
    x, w, b = _make_case(B, num_peak, num_tf, k1)
    out = jax.block_until_ready(subnet_forward(x, w, b))
    ref = x.reshape(B, -1) @ w.T + b
    assert out.shape == (B, 1)
    assert jnp.allclose(out, ref, atol=1e-5, rtol=1e-5)

    # Case 2: multi-step grid with a ragged trailing tile (B % tb != 0),
    # exercising the masked write-back path of the lane-dense output.
    B2 = 200
    x, w, b = _make_case(B2, num_peak, num_tf, k2)
    out = jax.block_until_ready(subnet_forward(x, w, b, row_tile=128))
    ref = x.reshape(B2, -1) @ w.T + b
    assert out.shape == (B2, 1)
    assert jnp.allclose(out, ref, atol=1e-5, rtol=1e-5)

    # Case 3: bf16 input-streaming path (in-kernel upcast, f32 accumulation).
    x, w, b = _make_case(B, num_peak, num_tf, k3, dtype=jnp.bfloat16)
    out = jax.block_until_ready(subnet_forward(x, w, b))
    ref = x.astype(jnp.float32).reshape(B, -1) @ w.T + b
    assert jnp.allclose(out, ref, atol=2e-2, rtol=2e-2)

    print("KERNEL_OK")
</pallas_src>

<mosaic_0001>
module attributes {stable_mosaic.version = 11 : i64} {
  func.func @_subnet_kernel(%arg0: i32, %arg1: memref<1xf32, #tpu.memory_space<smem>>, %arg2: memref<2x32xf32, #tpu.memory_space<vmem>>, %arg3: memref<1x32xf32, #tpu.memory_space<vmem>>, %arg4: memref<1x2xf32, #tpu.memory_space<vmem>>) attributes {dimension_semantics = [#tpu.dimension_semantics<parallel>], iteration_bounds = array<i64: 1>, scalar_prefetch = 0 : i64, scratch_operands = 0 : i64, tpu.core_type = #tpu.core_type<tc>, window_params = [{transform_indices = @transform_0, window_bounds = array<i64: 1>}, {transform_indices = @transform_1, window_bounds = array<i64: 2, 32>}, {pipeline_mode = #tpu.pipeline_mode<synchronous>, transform_indices = @transform_2, window_bounds = array<i64: 1, 32>}, {transform_indices = @transform_3, window_bounds = array<i64: 1, 2>}]} {
    %c0 = arith.constant 0 : index
    %c0_0 = arith.constant 0 : index
    %0 = vector.load %arg2[%c0, %c0_0] : memref<2x32xf32, #tpu.memory_space<vmem>>, vector<2x32xf32>
    %c0_1 = arith.constant 0 : index
    %c0_2 = arith.constant 0 : index
    %1 = vector.load %arg3[%c0_1, %c0_2] : memref<1x32xf32, #tpu.memory_space<vmem>>, vector<1x32xf32>
    %2 = vector.broadcast %1 : vector<1x32xf32> to vector<2x32xf32>
    %3 = arith.mulf %0, %2 : vector<2x32xf32>
    %cst = arith.constant dense<0.000000e+00> : vector<2xf32>
    %4 = vector.multi_reduction <add>, %3, %cst [1] : vector<2x32xf32> to vector<2xf32>
    %c0_3 = arith.constant 0 : index
    %5 = memref.load %arg1[%c0_3] : memref<1xf32, #tpu.memory_space<smem>>
    %6 = vector.broadcast %5 : f32 to vector<2xf32>
    %7 = arith.addf %4, %6 : vector<2xf32>
    %8 = vector.shape_cast %7 : vector<2xf32> to vector<1x2xf32>
    %c0_4 = arith.constant 0 : index
    %c0_5 = arith.constant 0 : index
    %9 = vector.load %arg4[%c0_4, %c0_5] : memref<1x2xf32, #tpu.memory_space<vmem>>, vector<1x2xf32>
    tpu.vector_store %arg4[%c0_4, %c0_5], %8 {strides = array<i32>} : memref<1x2xf32, #tpu.memory_space<vmem>>, vector<1x2xf32>,
    return
  }
  func.func @transform_0(%arg0: i32) -> i32 {
    %c0_i32 = arith.constant 0 : i32
    %c0_i32_0 = arith.constant 0 : i32
    return %c0_i32 : i32
  }
  func.func @transform_1(%arg0: i32) -> (i32, i32) {
    %c0_i32 = arith.constant 0 : i32
    %c0_i32_0 = arith.constant 0 : i32
    return %arg0, %c0_i32 : i32, i32
  }
  func.func @transform_2(%arg0: i32) -> (i32, i32) {
    %c0_i32 = arith.constant 0 : i32
    %c0_i32_0 = arith.constant 0 : i32
    %c0_i32_1 = arith.constant 0 : i32
    return %c0_i32, %c0_i32_0 : i32, i32
  }
  func.func @transform_3(%arg0: i32) -> (i32, i32) {
    %c0_i32 = arith.constant 0 : i32
    %c0_i32_0 = arith.constant 0 : i32
    return %c0_i32, %arg0 : i32, i32
  }
}

</mosaic_0001>

<bundles_post_ra>
// kernel: tpu_custom_call.1
= control target key start
LH: loop header
LB: loop body
LE: loop exit
PB: predicated region body
PF: predicated region fallthrough
CT: control target
= control target key end

     0   :  { %vm25_vm0 = vcmask 254976   ;;  %s124_s0 = inlined_call_operand.<no memory space> [shape: f32[1], index: 0, kind: input, shape index: {}]   ;;  %s125_s1 = inlined_call_operand.vmem [shape: f32[2,32], index: 1, kind: input, shape index: {}]   ;;  %s126_s2 = inlined_call_operand.vmem [shape: f32[1,32], index: 2, kind: input, shape index: {}]   ;;  %s127_s3 = inlined_call_operand.hbm [shape: f32[1,2], index: 3, kind: output, shape index: {}]  }
   0x1   :  { %v16_v0 = vld [vmem:[%s125_s1] sm:$0x3] }
   0x2   :  { %v56_v1 = vld [vmem:[%s126_s2] ss:$0 sm:$0xff] }
   0x3   :  { %v24_v2 = vmul.f32 %v56_v1, %v16_v0 }
   0x4   :  { %9 = vsyncpa [#allocation4], 0  ;;  %v33_v4 = vlaneseq  ;;  %v30_v7 = vstv %s124_s0  ;;  %s82_s18 = smov [#allocation3]   ;;  %vm40_vm1 = vcmask 8192  }
   0x5   :  { %v26_v3 = vsel %vm25_vm0, %v24_v2, 0.0  ;;  %s48_s1 = sshll.u32 %s82_s18, 4  ;;  %s49_s1 = int_to_ptr.vmem [resolvable:$true] %s48_s1 }
   0x6   :  { %27 = vadd.xlane.f32.xlu0 %v26_v3  ;;  %v34_v5 = vand.u32 127, %v33_v4  ;;  %v36_v6 = vshrl.u32 %v33_v4, 7  ;;  %s58_s2 = scalar_lea.vmem %s49_s1, 16  ;;  %s62_s19 = scalar_lea.vmem %s49_s1, 32 }
   0x7   :  { %p59_p0 = scmp.ne.s32.totalorder %s49_s1, %s58_s2  ;;  %p63_p1 = scmp.lt.s32.totalorder %s49_s1, %s49_s1 }
   0x8   :  { %v37_v8 = vsub.s32 %v34_v5, %v36_v6  ;;  %p64_p2 = scmp.lt.s32.totalorder %s62_s19, %s58_s2 }
   0xa   :  { %p65_p3 = por %p64_p2, %p63_p1 }
   0xc   :  { %p66_p4 = pnand %p65_p3, %p59_p0 }
  0x93   :  { %v28_v9 = vpop.xlane.xlu0 %27 }
  0x94   :  { %v31_v10 = vadd.f32 %v30_v7, %v28_v9 }
  0x96   :  { %v38_v11 = vrot.slane %v31_v10, %v37_v8 }
  0x98   :  { %41 = vst.msk [vmem:[#allocation3] sm:$0x1] %vm40_vm1, %v38_v11 }
  0x99   :  { %69 = shalt.err (!%p66_p4)
}
  0x9a   :  { %s70_s0 = scalar_lea.hbm %s127_s3, 16 }
  0x9b   :  { %p71_p5 = scmp.ne.s32.totalorder %s127_s3, %s70_s0  ;;  %p74_p6 = scmp.lt.u32.totalorder %s70_s0, %s127_s3 }
  0x9d   :  { %p76_p7 = pnand %p74_p6, %p71_p5 }
  0x9f   :  { %79 = shalt.err (!%p76_p7)
}
  0xa0   :  { %51 = dma.vmem_to_hbm [thread:$0]  %s49_s1, 16, %s127_s3, [#allocation4]  }
  0xa1   :  { %80 = dma.done.wait [#allocation4], 16  }
  0xa2   :  { %81 = vsyncadd [#allocation4], 4294967280 }
  0xa3   :  { %55 = vsyncpa [#allocation4], 1 }

</bundles_post_ra>
